<compile_context>
chip_gen: v7x
topology: tpu7x:2x2x1
jax: 0.10.0
libtpu: 0.0.40
codegen_flags: <defaults>
</compile_context>

<pallas_src>
import functools

import jax
import jax.numpy as jnp
from jax import lax
from jax.experimental import pallas as pl
from jax.experimental.pallas import tpu as pltpu

_LANE = 128


def _channel_attention_kernel(x_ref, w1t_ref, w2t_ref, out_ref,
                              sum_acc, max_acc, *,
                              hw_total, acc_w, n_chunks_full,
                              n_full_last, tail_last, block_needs_mask):
    """Grid = (B, n_k); per (b, k) one (1, C, t_hw) spatial tile is streamed.

    x_ref:    (1, C, t_hw)   input dtype (f32 / bf16)
    w1t_ref:  (C, Cr)  f32   first 1x1-conv weight, transposed
    w2t_ref:  (Cr, C)  f32   second 1x1-conv weight, transposed
    out_ref:  (1, 1, C) f32  lane-dense attention row
    sum_acc:  (C, acc_w) f32 running lane-wide partial sums
    max_acc:  (C, acc_w) f32 running lane-wide partial max
    """
    k = pl.program_id(1)
    n_k = pl.num_programs(1)

    @pl.when(k == 0)
    def _init():
        sum_acc[...] = jnp.zeros_like(sum_acc)
        max_acc[...] = jnp.full_like(max_acc, -jnp.inf)

    def accum(n_full, tail):
        # Per-chunk load/upcast/accumulate: only the two (C, acc_w)
        # accumulators plus one (C, acc_w) chunk are live at a time.
        s = sum_acc[...]
        m = max_acc[...]
        for j in range(n_full):
            xc = x_ref[0, :, j * acc_w:(j + 1) * acc_w].astype(jnp.float32)
            s = s + xc
            m = jnp.maximum(m, xc)
        if tail:  # static: only the boundary chunk of the last block
            j = n_full
            xc = x_ref[0, :, j * acc_w:(j + 1) * acc_w].astype(jnp.float32)
            lane = lax.broadcasted_iota(jnp.int32, xc.shape, 1)
            valid = lane < tail
            s = s + jnp.where(valid, xc, 0.0)
            m = jnp.maximum(m, jnp.where(valid, xc, -jnp.inf))
        sum_acc[...] = s
        max_acc[...] = m

    if block_needs_mask:
        # Mask work only exists on the final grid step; every other step is
        # plain add/max over full 128-lane chunks.
        @pl.when(k < n_k - 1)
        def _full_steps():
            accum(n_chunks_full, 0)

        @pl.when(k == n_k - 1)
        def _last_step():
            accum(n_full_last, tail_last)  # fully-OOB trailing chunks skipped
    else:
        accum(n_chunks_full, 0)

    @pl.when(k == n_k - 1)
    def _finalize():
        # Single cross-lane (XLU) reduce per pooled statistic.
        avg_col = jnp.sum(sum_acc[...], axis=-1, keepdims=True) * (1.0 / hw_total)
        max_col = jnp.max(max_acc[...], axis=-1, keepdims=True)
        pooled = jnp.concatenate([avg_col, max_col], axis=1)              # (C, 2)
        # h[p, r] = sum_c pooled[c, p] * w1[r, c]   (TN dot, no transposes)
        h = lax.dot_general(pooled, w1t_ref[...],
                            dimension_numbers=(((0,), (0,)), ((), ())),
                            preferred_element_type=jnp.float32)           # (2, Cr)
        h = jnp.maximum(h, 0.0)                                           # ReLU
        logits = jnp.dot(h, w2t_ref[...],
                         preferred_element_type=jnp.float32)              # (2, C)
        att = jax.nn.sigmoid(logits[0:1, :] + logits[1:2, :])             # (1, C)
        out_ref[...] = att[None]                                          # lane-dense row


def channel_attention(x_nchw, w1, w2, *, block_hw=None):
    """CBAM channel attention.

    x_nchw: (B, C, H, W) float32 or bfloat16
    w1:     (Cr, C)  first 1x1 conv weight (no bias), Cr = C // ratio
    w2:     (C, Cr)  second 1x1 conv weight (no bias)
    block_hw: optional spatial-tile width override (rounded to 128 lanes).
    Returns (B, C, 1, 1) float32 attention weights.
    """
    B, C, H, W = x_nchw.shape
    Cr = w1.shape[0]
    assert w1.shape == (Cr, C) and w2.shape == (C, Cr)
    HW = H * W
    itemsize = jnp.dtype(x_nchw.dtype).itemsize

    # --- spatial tile: multiple of 128 lanes, big enough to amortize the
    #     per-grid-step overhead, small enough for the 16 MiB scoped default ---
    if HW >= _LANE:
        hw_aligned = (HW // _LANE) * _LANE                      # multiple of 128, <= HW
        if block_hw is None:
            target_bytes = 4 * 1024 * 1024                      # ~4 MiB x tile
            t_hw = max(4 * _LANE,
                       (target_bytes // max(1, C * itemsize)) // _LANE * _LANE)
        else:
            t_hw = max(_LANE, (block_hw // _LANE) * _LANE)
        # Cap: 2x x-tile (double buffer) + 2x both weights + accumulators must
        # stay under ~12 MiB (headroom inside v5e's 16 MiB scoped default).
        budget_bytes = 12 * 1024 * 1024
        fixed_bytes = 2 * 2 * (Cr * C * 4) + 2 * C * _LANE * 4
        avail = max(budget_bytes - fixed_bytes, 2 * C * _LANE * itemsize)
        cap = max(_LANE, (avail // (2 * C * itemsize)) // _LANE * _LANE)
        t_hw = min(t_hw, cap, hw_aligned)
        acc_w = _LANE
    else:
        t_hw = HW                                               # full-dim block
        acc_w = HW

    n_k = pl.cdiv(HW, t_hw)
    n_chunks_full = t_hw // acc_w
    rem = HW % t_hw
    block_needs_mask = rem != 0
    n_full_last = (rem // acc_w) if block_needs_mask else 0
    tail_last = (rem % acc_w) if block_needs_mask else 0

    x_flat = x_nchw.reshape(B, C, HW)                           # stream native dtype
    w1t = w1.astype(jnp.float32).T                              # (C, Cr)
    w2t = w2.astype(jnp.float32).T                              # (Cr, C)

    kernel = functools.partial(
        _channel_attention_kernel,
        hw_total=HW, acc_w=acc_w, n_chunks_full=n_chunks_full,
        n_full_last=n_full_last, tail_last=tail_last,
        block_needs_mask=block_needs_mask)

    cost = pl.CostEstimate(
        flops=2 * B * C * HW + 8 * B * C * Cr,
        transcendentals=B * C,
        bytes_accessed=B * C * HW * itemsize + 2 * C * Cr * 4 + B * C * 4,
    )

    out = pl.pallas_call(
        kernel,
        out_shape=jax.ShapeDtypeStruct((B, 1, C), jnp.float32),
        grid_spec=pltpu.PrefetchScalarGridSpec(
            num_scalar_prefetch=0,
            grid=(B, n_k),                                      # reduction axis last
            in_specs=[
                pl.BlockSpec((1, C, t_hw), lambda b, k: (b, 0, k)),
                pl.BlockSpec((C, Cr), lambda b, k: (0, 0)),
                pl.BlockSpec((Cr, C), lambda b, k: (0, 0)),
            ],
            out_specs=pl.BlockSpec((1, 1, C), lambda b, k: (b, 0, 0)),
            scratch_shapes=[
                pltpu.VMEM((C, acc_w), jnp.float32),            # running sum
                pltpu.VMEM((C, acc_w), jnp.float32),            # running max
            ],
        ),
        compiler_params=pltpu.CompilerParams(
            dimension_semantics=("parallel", "arbitrary"),      # megacore over B
        ),
        cost_estimate=cost,
    )(x_flat, w1t, w2t)

    return out.reshape(B, C, 1, 1)


def _reference(x_nchw, w1, w2):
    """Pure-JAX reference mirroring the PyTorch forward."""
    x = x_nchw.astype(jnp.float32)
    avg = jnp.mean(x, axis=(2, 3))               # (B, C)
    mx = jnp.max(x, axis=(2, 3))                 # (B, C)

    def fc(p):
        h = jnp.maximum(p @ w1.T, 0.0)           # (B, Cr)
        return h @ w2.T                          # (B, C)

    return jax.nn.sigmoid(fc(avg) + fc(mx))[:, :, None, None]


if __name__ == "__main__":
    key = jax.random.PRNGKey(0)
    kx, k1, k2, kx2 = jax.random.split(key, 4)

    # in_planes=64, ratio=16 -> hidden=4 (module defaults at small scale).
    B, C, H, W = 2, 64, 24, 24
    ratio = 16
    Cr = C // ratio

    x = jax.random.normal(kx, (B, C, H, W), dtype=jnp.float32)
    w1 = jax.random.normal(k1, (Cr, C), dtype=jnp.float32) * (2.0 / C) ** 0.5
    w2 = jax.random.normal(k2, (C, Cr), dtype=jnp.float32) * (2.0 / Cr) ** 0.5

    ref = _reference(x, w1, w2)

    # Default auto-sized tile: 512-lane blocks + masked 64-lane tail (HW=576).
    out_default = jax.block_until_ready(channel_attention(x, w1, w2))
    # Smaller tile: exercises multiple unmasked steps + the masked last step.
    out_tiled = jax.block_until_ready(channel_attention(x, w1, w2, block_hw=256))

    assert out_default.shape == (B, C, 1, 1)
    assert jnp.allclose(out_default, ref, atol=1e-5, rtol=1e-5), "mismatch (default tile)"
    assert jnp.allclose(out_tiled, ref, atol=1e-5, rtol=1e-5), "mismatch (small tile)"

    # Exactly-divisible spatial extent (single-step, fully unmasked path).
    B2, C2, H2, W2 = 1, 32, 16, 16
    Cr2 = max(1, C2 // ratio)
    x2 = jax.random.normal(kx2, (B2, C2, H2, W2), dtype=jnp.float32)
    w1b = jax.random.normal(k1, (Cr2, C2), dtype=jnp.float32) * (2.0 / C2) ** 0.5
    w2b = jax.random.normal(k2, (C2, Cr2), dtype=jnp.float32) * (2.0 / Cr2) ** 0.5
    out2 = jax.block_until_ready(channel_attention(x2, w1b, w2b))
    assert jnp.allclose(out2, _reference(x2, w1b, w2b), atol=1e-5, rtol=1e-5), \
        "mismatch (divisible HW)"

    print("KERNEL_OK")
</pallas_src>

<mosaic_0001>
module attributes {stable_mosaic.version = 11 : i64} {
  func.func @_channel_attention_kernel(%arg0: i32, %arg1: i32, %arg2: memref<1x64x512xf32, #tpu.memory_space<vmem>>, %arg3: memref<64x4xf32, #tpu.memory_space<vmem>>, %arg4: memref<4x64xf32, #tpu.memory_space<vmem>>, %arg5: memref<1x1x64xf32, #tpu.memory_space<vmem>>, %arg6: memref<64x128xf32, #tpu.memory_space<vmem>>, %arg7: memref<64x128xf32, #tpu.memory_space<vmem>>) attributes {dimension_semantics = [#tpu.dimension_semantics<parallel>, #tpu.dimension_semantics<arbitrary>], iteration_bounds = array<i64: 2, 2>, scalar_prefetch = 0 : i64, scratch_operands = 2 : i64, tpu.core_type = #tpu.core_type<tc>, window_params = [{transform_indices = @transform_0, window_bounds = array<i64: 1, 64, 512>}, {pipeline_mode = #tpu.pipeline_mode<synchronous>, transform_indices = @transform_1, window_bounds = array<i64: 64, 4>}, {pipeline_mode = #tpu.pipeline_mode<synchronous>, transform_indices = @transform_2, window_bounds = array<i64: 4, 64>}, {transform_indices = @transform_3, window_bounds = array<i64: 1, 1, 64>}]} {
    %c0_i32 = arith.constant 0 : i32
    %0 = arith.cmpi eq, %arg1, %c0_i32 : i32
    %1 = arith.extui %0 : i1 to i32
    %c0_i32_0 = arith.constant 0 : i32
    %2 = arith.cmpi ne, %1, %c0_i32_0 : i32
    scf.if %2 {
      %cst = arith.constant 0.000000e+00 : f32
      %12 = vector.broadcast %cst : f32 to vector<64x128xf32>
      %c0 = arith.constant 0 : index
      %c0_6 = arith.constant 0 : index
      %13 = vector.load %arg6[%c0, %c0_6] : memref<64x128xf32, #tpu.memory_space<vmem>>, vector<64x128xf32>
      tpu.vector_store %arg6[%c0, %c0_6], %12 {strides = array<i32>} : memref<64x128xf32, #tpu.memory_space<vmem>>, vector<64x128xf32>,
      %cst_7 = arith.constant 0xFF800000 : f32
      %14 = vector.broadcast %cst_7 : f32 to vector<64x128xf32>
      %c0_8 = arith.constant 0 : index
      %c0_9 = arith.constant 0 : index
      %15 = vector.load %arg7[%c0_8, %c0_9] : memref<64x128xf32, #tpu.memory_space<vmem>>, vector<64x128xf32>
      tpu.vector_store %arg7[%c0_8, %c0_9], %14 {strides = array<i32>} : memref<64x128xf32, #tpu.memory_space<vmem>>, vector<64x128xf32>,
    } else {
    }
    %c1_i32 = arith.constant 1 : i32
    %3 = arith.cmpi slt, %arg1, %c1_i32 : i32
    %4 = arith.extui %3 : i1 to i32
    %c0_i32_1 = arith.constant 0 : i32
    %5 = arith.cmpi ne, %4, %c0_i32_1 : i32
    scf.if %5 {
      %c0 = arith.constant 0 : index
      %c0_6 = arith.constant 0 : index
      %12 = vector.load %arg6[%c0, %c0_6] : memref<64x128xf32, #tpu.memory_space<vmem>>, vector<64x128xf32>
      %c0_7 = arith.constant 0 : index
      %c0_8 = arith.constant 0 : index
      %13 = vector.load %arg7[%c0_7, %c0_8] : memref<64x128xf32, #tpu.memory_space<vmem>>, vector<64x128xf32>
      %c0_9 = arith.constant 0 : index
      %c0_10 = arith.constant 0 : index
      %c0_11 = arith.constant 0 : index
      %14 = vector.load %arg2[%c0_9, %c0_10, %c0_11] : memref<1x64x512xf32, #tpu.memory_space<vmem>>, vector<1x64x128xf32>
      %15 = vector.shape_cast %14 : vector<1x64x128xf32> to vector<64x128xf32>
      %16 = arith.addf %12, %15 : vector<64x128xf32>
      %17 = arith.maximumf %13, %15 : vector<64x128xf32>
      %c0_12 = arith.constant 0 : index
      %c0_13 = arith.constant 0 : index
      %c128 = arith.constant 128 : index
      %18 = vector.load %arg2[%c0_12, %c0_13, %c128] : memref<1x64x512xf32, #tpu.memory_space<vmem>>, vector<1x64x128xf32>
      %19 = vector.shape_cast %18 : vector<1x64x128xf32> to vector<64x128xf32>
      %20 = arith.addf %16, %19 : vector<64x128xf32>
      %21 = arith.maximumf %17, %19 : vector<64x128xf32>
      %c0_14 = arith.constant 0 : index
      %c0_15 = arith.constant 0 : index
      %c256 = arith.constant 256 : index
      %22 = vector.load %arg2[%c0_14, %c0_15, %c256] : memref<1x64x512xf32, #tpu.memory_space<vmem>>, vector<1x64x128xf32>
      %23 = vector.shape_cast %22 : vector<1x64x128xf32> to vector<64x128xf32>
      %24 = arith.addf %20, %23 : vector<64x128xf32>
      %25 = arith.maximumf %21, %23 : vector<64x128xf32>
      %c0_16 = arith.constant 0 : index
      %c0_17 = arith.constant 0 : index
      %c384 = arith.constant 384 : index
      %26 = vector.load %arg2[%c0_16, %c0_17, %c384] : memref<1x64x512xf32, #tpu.memory_space<vmem>>, vector<1x64x128xf32>
      %27 = vector.shape_cast %26 : vector<1x64x128xf32> to vector<64x128xf32>
      %28 = arith.addf %24, %27 : vector<64x128xf32>
      %29 = arith.maximumf %25, %27 : vector<64x128xf32>
      %c0_18 = arith.constant 0 : index
      %c0_19 = arith.constant 0 : index
      %30 = vector.load %arg6[%c0_18, %c0_19] : memref<64x128xf32, #tpu.memory_space<vmem>>, vector<64x128xf32>
      tpu.vector_store %arg6[%c0_18, %c0_19], %28 {strides = array<i32>} : memref<64x128xf32, #tpu.memory_space<vmem>>, vector<64x128xf32>,
      %c0_20 = arith.constant 0 : index
      %c0_21 = arith.constant 0 : index
      %31 = vector.load %arg7[%c0_20, %c0_21] : memref<64x128xf32, #tpu.memory_space<vmem>>, vector<64x128xf32>
      tpu.vector_store %arg7[%c0_20, %c0_21], %29 {strides = array<i32>} : memref<64x128xf32, #tpu.memory_space<vmem>>, vector<64x128xf32>,
    } else {
    }
    %c1_i32_2 = arith.constant 1 : i32
    %6 = arith.cmpi eq, %arg1, %c1_i32_2 : i32
    %7 = arith.extui %6 : i1 to i32
    %c0_i32_3 = arith.constant 0 : i32
    %8 = arith.cmpi ne, %7, %c0_i32_3 : i32
    scf.if %8 {
      %c0 = arith.constant 0 : index
      %c0_6 = arith.constant 0 : index
      %12 = vector.load %arg6[%c0, %c0_6] : memref<64x128xf32, #tpu.memory_space<vmem>>, vector<64x128xf32>
      %c0_7 = arith.constant 0 : index
      %c0_8 = arith.constant 0 : index
      %13 = vector.load %arg7[%c0_7, %c0_8] : memref<64x128xf32, #tpu.memory_space<vmem>>, vector<64x128xf32>
      %c0_9 = arith.constant 0 : index
      %c0_10 = arith.constant 0 : index
      %c0_11 = arith.constant 0 : index
      %14 = vector.load %arg2[%c0_9, %c0_10, %c0_11] : memref<1x64x512xf32, #tpu.memory_space<vmem>>, vector<1x64x128xf32>
      %15 = vector.shape_cast %14 : vector<1x64x128xf32> to vector<64x128xf32>
      %16 = tpu.iota {dimensions = array<i32: 1>} : vector<64x128xi32>
      %c64_i32 = arith.constant 64 : i32
      %17 = vector.broadcast %c64_i32 : i32 to vector<64x128xi32>
      %18 = arith.cmpi slt, %16, %17 : vector<64x128xi32>
      %cst = arith.constant 0.000000e+00 : f32
      %19 = vector.broadcast %cst : f32 to vector<64x128xf32>
      %20 = arith.select %18, %15, %19 : vector<64x128xi1>, vector<64x128xf32>
      %21 = arith.addf %12, %20 : vector<64x128xf32>
      %cst_12 = arith.constant 0xFF800000 : f32
      %22 = vector.broadcast %cst_12 : f32 to vector<64x128xf32>
      %23 = arith.select %18, %15, %22 : vector<64x128xi1>, vector<64x128xf32>
      %24 = arith.maximumf %13, %23 : vector<64x128xf32>
      %c0_13 = arith.constant 0 : index
      %c0_14 = arith.constant 0 : index
      %25 = vector.load %arg6[%c0_13, %c0_14] : memref<64x128xf32, #tpu.memory_space<vmem>>, vector<64x128xf32>
      tpu.vector_store %arg6[%c0_13, %c0_14], %21 {strides = array<i32>} : memref<64x128xf32, #tpu.memory_space<vmem>>, vector<64x128xf32>,
      %c0_15 = arith.constant 0 : index
      %c0_16 = arith.constant 0 : index
      %26 = vector.load %arg7[%c0_15, %c0_16] : memref<64x128xf32, #tpu.memory_space<vmem>>, vector<64x128xf32>
      tpu.vector_store %arg7[%c0_15, %c0_16], %24 {strides = array<i32>} : memref<64x128xf32, #tpu.memory_space<vmem>>, vector<64x128xf32>,
    } else {
    }
    %c1_i32_4 = arith.constant 1 : i32
    %9 = arith.cmpi eq, %arg1, %c1_i32_4 : i32
    %10 = arith.extui %9 : i1 to i32
    %c0_i32_5 = arith.constant 0 : i32
    %11 = arith.cmpi ne, %10, %c0_i32_5 : i32
    scf.if %11 {
      %c0 = arith.constant 0 : index
      %c0_6 = arith.constant 0 : index
      %12 = vector.load %arg6[%c0, %c0_6] : memref<64x128xf32, #tpu.memory_space<vmem>>, vector<64x128xf32>
      %cst = arith.constant dense<0.000000e+00> : vector<64xf32>
      %13 = vector.multi_reduction <add>, %12, %cst [1] : vector<64x128xf32> to vector<64xf32>
      %14 = vector.shape_cast %13 : vector<64xf32> to vector<64x1xf32>
      %cst_7 = arith.constant 0.00173611112 : f32
      %15 = vector.broadcast %cst_7 : f32 to vector<64x1xf32>
      %16 = arith.mulf %14, %15 : vector<64x1xf32>
      %c0_8 = arith.constant 0 : index
      %c0_9 = arith.constant 0 : index
      %17 = vector.load %arg7[%c0_8, %c0_9] : memref<64x128xf32, #tpu.memory_space<vmem>>, vector<64x128xf32>
      %cst_10 = arith.constant dense<0xFF800000> : vector<64xf32>
      %18 = vector.multi_reduction <maximumf>, %17, %cst_10 [1] : vector<64x128xf32> to vector<64xf32>
      %19 = vector.shape_cast %18 : vector<64xf32> to vector<64x1xf32>
      %20 = tpu.concatenate %16, %19 in 1 : vector<64x1xf32>, vector<64x1xf32> -> vector<64x2xf32>
      %c0_11 = arith.constant 0 : index
      %c0_12 = arith.constant 0 : index
      %21 = vector.load %arg3[%c0_11, %c0_12] : memref<64x4xf32, #tpu.memory_space<vmem>>, vector<64x4xf32>
      %cst_13 = arith.constant dense<0.000000e+00> : vector<2x4xf32>
      %22 = tpu.matmul %20, %21, %cst_13 {dimension_numbers = #tpu.dot_dimension_numbers<[0], [0], [1], [1], [0, 1, 1, 1], [], []>} : vector<64x2xf32>, vector<64x4xf32>, vector<2x4xf32> -> vector<2x4xf32>
      %cst_14 = arith.constant 0.000000e+00 : f32
      %23 = vector.broadcast %cst_14 : f32 to vector<2x4xf32>
      %24 = arith.maximumf %22, %23 : vector<2x4xf32>
      %c0_15 = arith.constant 0 : index
      %c0_16 = arith.constant 0 : index
      %25 = vector.load %arg4[%c0_15, %c0_16] : memref<4x64xf32, #tpu.memory_space<vmem>>, vector<4x64xf32>
      %cst_17 = arith.constant dense<0.000000e+00> : vector<2x64xf32>
      %26 = tpu.matmul %24, %25, %cst_17 {dimension_numbers = #tpu.dot_dimension_numbers<[1], [0], [0], [1], [0, 0, 1, 1], [], []>} : vector<2x4xf32>, vector<4x64xf32>, vector<2x64xf32> -> vector<2x64xf32>
      %27 = vector.extract_strided_slice %26 {offsets = [0, 0], sizes = [1, 64], strides = [1, 1]} : vector<2x64xf32> to vector<1x64xf32>
      %28 = vector.extract_strided_slice %26 {offsets = [1, 0], sizes = [1, 64], strides = [1, 1]} : vector<2x64xf32> to vector<1x64xf32>
      %29 = arith.addf %27, %28 : vector<1x64xf32>
      %30 = arith.negf %29 : vector<1x64xf32>
      %31 = math.exp %30 : vector<1x64xf32>
      %cst_18 = arith.constant 1.000000e+00 : f32
      %32 = vector.broadcast %cst_18 : f32 to vector<1x64xf32>
      %33 = arith.addf %32, %31 : vector<1x64xf32>
      %34 = arith.divf %32, %33 : vector<1x64xf32>
      %35 = vector.shape_cast %34 : vector<1x64xf32> to vector<1x1x64xf32>
      %c0_19 = arith.constant 0 : index
      %c0_20 = arith.constant 0 : index
      %c0_21 = arith.constant 0 : index
      %36 = vector.load %arg5[%c0_19, %c0_20, %c0_21] : memref<1x1x64xf32, #tpu.memory_space<vmem>>, vector<1x1x64xf32>
      tpu.vector_store %arg5[%c0_19, %c0_20, %c0_21], %35 {strides = array<i32>} : memref<1x1x64xf32, #tpu.memory_space<vmem>>, vector<1x1x64xf32>,
    } else {
    }
    return
  }
  func.func @transform_0(%arg0: i32, %arg1: i32) -> (i32, i32, i32) {
    %c0_i32 = arith.constant 0 : i32
    %c0_i32_0 = arith.constant 0 : i32
    return %arg0, %c0_i32, %arg1 : i32, i32, i32
  }
  func.func @transform_1(%arg0: i32, %arg1: i32) -> (i32, i32) {
    %c0_i32 = arith.constant 0 : i32
    %c0_i32_0 = arith.constant 0 : i32
    %c0_i32_1 = arith.constant 0 : i32
    return %c0_i32, %c0_i32_0 : i32, i32
  }
  func.func @transform_2(%arg0: i32, %arg1: i32) -> (i32, i32) {
    %c0_i32 = arith.constant 0 : i32
    %c0_i32_0 = arith.constant 0 : i32
    %c0_i32_1 = arith.constant 0 : i32
    return %c0_i32, %c0_i32_0 : i32, i32
  }
  func.func @transform_3(%arg0: i32, %arg1: i32) -> (i32, i32, i32) {
    %c0_i32 = arith.constant 0 : i32
    %c0_i32_0 = arith.constant 0 : i32
    %c0_i32_1 = arith.constant 0 : i32
    return %arg0, %c0_i32, %c0_i32_0 : i32, i32, i32
  }
}

</mosaic_0001>

<bundles_post_ra>
// kernel: tpu_custom_call.1
= control target key start
LH: loop header
LB: loop body
LE: loop exit
PB: predicated region body
PF: predicated region fallthrough
CT: control target
= control target key end

     0   :  { %8 = vsyncpa [#allocation5], 0  ;;  %s1613_s0 = inlined_call_operand.hbm [shape: f32[2,64,576], index: 0, kind: input, shape index: {}]   ;;  %s1614_s1 = inlined_call_operand.vmem [shape: f32[64,4], index: 1, kind: input, shape index: {}]   ;;  %s1615_s2 = inlined_call_operand.vmem [shape: f32[4,64], index: 2, kind: input, shape index: {}]   ;;  %s1616_s3 = inlined_call_operand.hbm [shape: f32[2,1,64], index: 3, kind: output, shape index: {}]  }
   0x1   :  { %10 = vsyncpa [#allocation5 + $0x1], 0 }
   0x2   :  { %11 = vsyncpa [#allocation6], 0 }
   0x3   :  { %13 = vsyncpa [#allocation6 + $0x1], 0  ;;  %s1173_s12 = smov 0   ;;  %s1175_s13 = smov 0  }
   0x4   :  { %s1177_s14 = smov 0   ;;  %s1179_s15 = smov 0  }
   0x5   :  { %s1181_s16 = smov 0   ;;  %s1183_s17 = smov 0  }
   0x6   :  { %s1185_s18 = smov 0   ;;  %s1187_s19 = smov 0  }
   0x7   :  { %s1189_s20 = smov 0   ;;  %s1191_s21 = smov 0  }
   0x8   :  { %s1193_s22 = smov 0  }
   0x9 LB: > { %1621 = sst [smem:[#allocation10_spill]] %s1122_s17  ;;  %s811_s23 = sadd.s32 4294967295, %s1142_s22   ;;  %s1142_s22 = sphi %s1193_s22, %s19_s22   ;;  %s1138_s21 = sphi %s1191_s21, %s1642_s21   ;;  %s1134_s20 = sphi %s1189_s20, %s1634_s20   ;;  %s1130_s19 = sphi %s1187_s19, %s1641_s19   ;;  %s1126_s18 = sphi %s1185_s18, %s1633_s18   ;;  %s1122_s17 = sphi %s1183_s17, %s1632_s17   ;;  %s1118_s16 = sphi %s1181_s16, %s1640_s16   ;;  %s1114_s15 = sphi %s1179_s15, %s1639_s15   ;;  %s1110_s14 = sphi %s1177_s14, %s1638_s14   ;;  %s1106_s13 = sphi %s1175_s13, %s1637_s13   ;;  %s1102_s12 = sphi %s1173_s12, %s1636_s12  }
   0xa   : > { %1622 = sst [smem:[#allocation11_spill]] %s1134_s20  ;;  %s812_s24 = sadd.s32 4294967294, %s1142_s22  }
   0xb   : > { %s28_s25 = sadd.s32 1, %s1134_s20  ;;  %s31_s26 = sadd.s32 1, %s1138_s21 }
   0xc   : > { %p29_p0 = scmp.ge.s32.totalorder %s28_s25, 2  ;;  %s40_s27 = sadd.s32 1, %s1122_s17 }
   0xd   : > { %p47_p1 = scmp.ne.s32.totalorder %s1122_s17, %s1118_s16  ;;  %p48_p2 = scmp.eq.s32.totalorder %s1142_s22, 0 }
   0xe   : > { %s1644_s25 = smov (%p29_p0, %s28_s25), 0  ;;  %s1646_s26 = smov (!%p29_p0, %s31_s26), %s1138_s21 }
   0xf   : > { %1623 = sst [smem:[#allocation12_spill]] %s1644_s25  ;;  %s36_s28 = ssub.s32 %s1134_s20, %s1644_s25 }
  0x10   : > { %p1239_p3 = por %p48_p2, %p47_p1  ;;  %p33_p4 = scmp.ge.s32.totalorder %s1646_s26, 2 }
  0x11   : > { %p53_p5 = scmp.ne.s32.totalorder %s1118_s16, %s1114_s15  ;;  %p54_p6 = scmp.eq.s32.totalorder %s811_s23, 0 }
  0x12   : > { %s108_s30 = sadd.s32 1, %s1110_s14  ;;  %s1648_s26 = smov (%p33_p4, %s1646_s26), 0 }
  0x13   : > { %1625 = sst [smem:[#allocation13_spill]] %s1648_s26  ;;  %p1247_p7 = por %p54_p6, %p53_p5 }
  0x14   : > { %p118_p8 = scmp.ne.s32.totalorder %s1110_s14, %s1106_s13  ;;  %s35_s5 = ssub.s32 %s1138_s21, %s1648_s26 }
  0x15   : > { %p119_p9 = scmp.eq.s32.totalorder %s811_s23, 3  ;;  %s37_s6 = sor.u32 %s36_s28, %s35_s5 }
  0x16   : > { %p106_p10 = scmp.eq.s32.totalorder %s35_s5, 0  ;;  %p38_p11 = scmp.eq.s32.totalorder %s37_s6, 0 }
  0x17   : > { %p1255_p12 = por %p119_p9, %p118_p8  ;;  %p124_p13 = scmp.ne.s32.totalorder %s1106_s13, %s1102_s12 }
  0x18   : > { %s1260_s8 = scalar_select %p106_p10, %s1110_s14, %s108_s30  }
  0x19   : > { %s1263_s9 = scalar_select %p38_p11, %s1122_s17, %s40_s27  }
  0x1a   : > { %p125_p0 = scmp.eq.s32.totalorder %s812_s24, 3  ;;  %p814_p2 = scmp.ge.s32.totalorder %s1142_s22, 4 }
  0x1b   : > { %1628 = sst [smem:[#allocation14_spill]] %s1263_s9 }
  0x1c   : > { %p1267_p1 = por %p125_p0, %p124_p13  ;;  %147 = sbr.rel (%p814_p2) target bundleno = 72 (0x48), region = 24 }
  0x1e   : > { %s1629_s10 = scalar_select %p1267_p1, 1, 0 }
  0x23   : > { %150 = sbr.rel (!%p1239_p3) target bundleno = 72 (0x48), region = 28  ;;  %s151_s11 = sand.u32 (%p1239_p3), 1, %s1122_s17  }
  0x24   : > { %s816_s15 = sshll.u32 (%p1239_p3), %s1134_s20, 2  ;;  %s815_s23 = sshll.u32 (%p1239_p3), %s151_s11, 8 }
  0x25   : > { %s157_s28 = ssub.s32 (%p1239_p3), 5, %s816_s15  ;;  %s1282_s30 = scalar_lea.sflag (%p1239_p3), [#allocation5], %s151_s11 }
  0x26   : > { %p158_p4 = scmp.lt.s32.totalorder (%p1239_p3), %s157_s28, 4  ;;  %s155_s5 = scalar_lea.vmem (%p1239_p3), [#allocation4], %s815_s23 }
  0x2a   : > { %s1650_s28 = smov (!%p158_p4, %s157_s28), 4 }
  0x2b   : > { %s1279_s24 = sshll.u32 %s1650_s28, 10 }
  0x2c   : > { %s162_s27 = ssub.s32 4096, %s1279_s24 }
  0x2d   : > { %163 = vsyncadd %s1282_s30, %s162_s27  ;;  %p818_p3 = scmp.ne.s32.totalorder %s1279_s24, 0  ;;  %s884_s29 = smul.u32 40, %s1138_s21 }
  0x2e   : > { %s820_s6 = sshll.u32 %s1650_s28, 3  ;;  %s171_s26 = sshll.u32 %s155_s5, 4  ;;  %s1288_s26 = int_to_ptr.vmem [resolvable:$true] %s171_s26 }
  0x2f   : > { %s166_s25 = sadd.s32 %s884_s29, %s816_s15  ;;  %s996_s15 = scalar_lea.hbm %s1613_s0, 10240 }
  0x30   : > { %s819_s20 = sshll.u32 %s166_s25, 7 }
  0x31   : > { %s1293_s11 = scalar_lea.hbm %s1613_s0, %s819_s20 }
  0x32   : > { %s992_s23 = scalar_lea.hbm %s1293_s11, %s1279_s24  ;;  %p997_p9 = scmp.lt.u32.totalorder %s1293_s11, %s1613_s0 }
  0x33   : > { %p993_p5 = scmp.ne.s32.totalorder %s1293_s11, %s992_s23  ;;  %p998_p10 = scmp.lt.u32.totalorder %s996_s15, %s992_s23 }
  0x34   : > { %p1000_p13 = scmp.lt.u32.totalorder %s992_s23, %s1293_s11 }
  0x35   : > { %p994_p6 = pnand %p993_p5, %p818_p3  ;;  %p999_p11 = por %p998_p10, %p997_p9 }
  0x37   : > { %p995_p8 = pneg %p994_p6  ;;  %p1001_p0 = por %p1000_p13, %p999_p11 }
  0x39   : > { %p1002_p2 = pnand %p1001_p0, %p995_p8 }
  0x3b   : > { %1005 = shalt.err (!%p1002_p2)
}
  0x3c   : > { %s1006_s17 = scalar_lea.vmem %s1288_s26, %s1279_s24  ;;  %s1144_s20 = smov [#allocation4]  }
  0x3d   : > { %p1007_p4 = scmp.ne.s32.totalorder %s1288_s26, %s1006_s17  ;;  %s1010_s9 = sshll.u32 %s1144_s20, 4  ;;  %s1011_s9 = int_to_ptr.vmem [resolvable:$false] %s1010_s9 }
  0x3e   : > { %s1012_s27 = scalar_lea.vmem %s1011_s9, 8192  ;;  %p1013_p1 = scmp.lt.s32.totalorder %s1288_s26, %s1011_s9 }
  0x3f   : > { %p1008_p5 = pnand %p1007_p4, %p818_p3  ;;  %p1014_p9 = scmp.lt.s32.totalorder %s1012_s27, %s1006_s17 }
  0x41   : > { %p1009_p6 = pneg %p1008_p5  ;;  %p1015_p10 = por %p1014_p9, %p1013_p1 }
  0x43   : > { %p1016_p11 = pnand %p1015_p10, %p1009_p6 }
  0x45   : > { %1019 = shalt.err (!%p1016_p11)
}
  0x46   : > { %s1145_s23 = smov 640   ;;  %s1146_s5 = smov 512  }
  0x47   : > { %177 = dma.hbm_to_vmem [thread:$0]  (%p818_p3), %s1293_s11, %s1279_s24, %s1288_s26, %s1282_s30, %s1145_s23, %s1146_s5, %s820_s6  }
  0x48 PF: > { %p823_p8 = scmp.ge.s32.totalorder %s1142_s22, 1  ;;  %p179_p13 = scmp.lt.s32.totalorder %s1142_s22, 5 }
  0x4a   : > { %p180_p1 = pnand %p823_p8, %p179_p13 }
  0x4b   : > { %s185_s15 = sand.u32 (!%p180_p1), 1, %s1118_s16  }
  0x4c   : > { %183 = sbr.rel (%p180_p1) target bundleno = 890 (0x37a), region = 32  ;;  %s824_s29 = sshll.u32 (!%p180_p1), %s185_s15, 8 }
  0x4d   : > { %s186_s25 = scalar_lea.sflag (!%p180_p1), [#allocation5], %s185_s15  ;;  %s1325_s17 = scalar_lea.vmem (!%p180_p1), [#allocation4], %s824_s29 }
  0x53   : > { %1093 = dma.done.wait (%p1247_p7), %s186_s25, 4096  }
  0x54   : > { %1095 = vsyncadd (%p1247_p7), %s186_s25, 4294963200  ;;  %s209_s26 = sand.u32 1, %s1106_s13   ;;  %p825_p3 = scmp.ne.s32.totalorder %s1126_s18, 0 }
  0x55   : > { %s1334_s28 = scalar_lea.vmem [#allocation7], %s209_s26  ;;  %v1147_v0 = vmov (!%p825_p3), 0.0   ;;  %v1148_v1 = vmov (!%p825_p3), -inf  }
  0x56   : > { %219 = sbr.rel (%p825_p3) target bundleno = 94 (0x5e), region = 40  ;;  %220 = vst [vmem:[#allocation2] sm:$0xff] (!%p825_p3), %v1147_v0  ;;  %221 = vst [vmem:[#allocation2 + $0x8] sm:$0xff] (!%p825_p3), %v1147_v0 }
  0x57   : > { %222 = vst [vmem:[#allocation2 + $0x10] sm:$0xff] (!%p825_p3), %v1147_v0  ;;  %223 = vst [vmem:[#allocation2 + $0x18] sm:$0xff] (!%p825_p3), %v1147_v0 }
  0x58   : > { %224 = vst [vmem:[#allocation2 + $0x20] sm:$0xff] (!%p825_p3), %v1147_v0  ;;  %225 = vst [vmem:[#allocation2 + $0x28] sm:$0xff] (!%p825_p3), %v1147_v0 }
  0x59   : > { %226 = vst [vmem:[#allocation2 + $0x30] sm:$0xff] (!%p825_p3), %v1147_v0  ;;  %227 = vst [vmem:[#allocation2 + $0x38] sm:$0xff] (!%p825_p3), %v1147_v0 }
  0x5a   : > { %228 = vst [vmem:[#allocation3] sm:$0xff] (!%p825_p3), %v1148_v1  ;;  %229 = vst [vmem:[#allocation3 + $0x8] sm:$0xff] (!%p825_p3), %v1148_v1 }
  0x5b   : > { %230 = vst [vmem:[#allocation3 + $0x10] sm:$0xff] (!%p825_p3), %v1148_v1  ;;  %231 = vst [vmem:[#allocation3 + $0x18] sm:$0xff] (!%p825_p3), %v1148_v1 }
  0x5c   : > { %232 = vst [vmem:[#allocation3 + $0x20] sm:$0xff] (!%p825_p3), %v1148_v1  ;;  %233 = vst [vmem:[#allocation3 + $0x28] sm:$0xff] (!%p825_p3), %v1148_v1 }
  0x5d   : > { %234 = vst [vmem:[#allocation3 + $0x30] sm:$0xff] %v1148_v1  ;;  %235 = vst [vmem:[#allocation3 + $0x38] sm:$0xff] %v1148_v1 }
  0x5e PF: > { %p826_p7 = scmp.ge.s32.totalorder %s1126_s18, 1 }
  0x5f   : > { %v240_v2 = vld [vmem:[#allocation2] sm:$0xff] (!%p826_p7)  ;;  %v1342_v4 = vld [vmem:[%s1325_s17 + $0x8] sm:$0xff] (!%p826_p7)  ;;  %v1346_v6 = vld [vmem:[%s1325_s17 + $0x10] sm:$0xff] (!%p826_p7) }
  0x60   : > { %239 = sbr.rel (%p826_p7) target bundleno = 124 (0x7c), region = 44  ;;  %v1339_v3 = vld [vmem:[%s1325_s17] sm:$0xff] (!%p826_p7)  ;;  %v241_v7 = vld [vmem:[#allocation2 + $0x8] sm:$0xff] (!%p826_p7)  ;;  %v1349_v8 = vld [vmem:[%s1325_s17 + $0x18] sm:$0xff] (!%p826_p7) }
  0x61   : > { %v264_v5 = vadd.f32 (!%p826_p7), %v1339_v3, %v240_v2  ;;  %v1352_v9 = vld [vmem:[%s1325_s17 + $0x20] sm:$0xff] (!%p826_p7)  ;;  %v1355_v10 = vld [vmem:[%s1325_s17 + $0x28] sm:$0xff] (!%p826_p7)  ;;  %v1360_v13 = vld [vmem:[%s1325_s17 + $0x30] sm:$0xff] (!%p826_p7) }
  0x62   : > { %v265_v12 = vadd.f32 (!%p826_p7), %v1352_v9, %v241_v7  ;;  %v242_v14 = vld [vmem:[#allocation2 + $0x10] sm:$0xff] (!%p826_p7)  ;;  %v1363_v15 = vld [vmem:[%s1325_s17 + $0x40] sm:$0xff] (!%p826_p7)  ;;  %v1366_v16 = vld [vmem:[%s1325_s17 + $0x38] sm:$0xff] (!%p826_p7) }
  0x63   : > { %v288_v11 = vadd.f32 (!%p826_p7), %v1342_v4, %v264_v5  ;;  %v266_v17 = vadd.f32 (!%p826_p7), %v1363_v15, %v242_v14  ;;  %v1370_v18 = vld [vmem:[%s1325_s17 + $0x48] sm:$0xff] (!%p826_p7)  ;;  %v1373_v19 = vld [vmem:[%s1325_s17 + $0x50] sm:$0xff] (!%p826_p7)  ;;  %v243_v22 = vld [vmem:[#allocation2 + $0x18] sm:$0xff] (!%p826_p7) }
  0x64   : > { %v289_v21 = vadd.f32 (!%p826_p7), %v1355_v10, %v265_v12  ;;  %v1378_v23 = vld [vmem:[%s1325_s17 + $0x60] sm:$0xff] (!%p826_p7)  ;;  %v1381_v24 = vld [vmem:[%s1325_s17 + $0x68] sm:$0xff] (!%p826_p7)  ;;  %v1385_v26 = vld [vmem:[%s1325_s17 + $0x58] sm:$0xff] (!%p826_p7) }
  0x65   : > { %v312_v20 = vadd.f32 (!%p826_p7), %v1346_v6, %v288_v11  ;;  %v290_v25 = vadd.f32 (!%p826_p7), %v1370_v18, %v266_v17  ;;  %v267_v27 = vadd.f32 (!%p826_p7), %v1378_v23, %v243_v22  ;;  %v1389_v28 = vld [vmem:[%s1325_s17 + $0x70] sm:$0xff] (!%p826_p7)  ;;  %v244_v29 = vld [vmem:[#allocation2 + $0x20] sm:$0xff] (!%p826_p7)  ;;  %v1394_v32 = vld [vmem:[%s1325_s17 + $0x78] sm:$0xff] (!%p826_p7) }
  0x66   : > { %v313_v31 = vadd.f32 (!%p826_p7), %v1360_v13, %v289_v21  ;;  %v1397_v33 = vld [vmem:[%s1325_s17 + $0x80] sm:$0xff] (!%p826_p7)  ;;  %v1400_v34 = vld [vmem:[%s1325_s17 + $0x88] sm:$0xff] (!%p826_p7)  ;;  %v1406_v38 = vld [vmem:[%s1325_s17 + $0x90] sm:$0xff] (!%p826_p7) }
  0x67   : > { %v336_v30 = vadd.f32 %v1349_v8, %v312_v20  ;;  %v314_v35 = vadd.f32 %v1373_v19, %v290_v25  ;;  %v291_v36 = vadd.f32 %v1381_v24, %v267_v27  ;;  %v268_v37 = vadd.f32 %v1397_v33, %v244_v29  ;;  %v245_v39 = vld [vmem:[#allocation2 + $0x28] sm:$0xff]  ;;  %v1409_v40 = vld [vmem:[%s1325_s17 + $0xa0] sm:$0xff]  ;;  %v1413_v42 = vld [vmem:[%s1325_s17 + $0x98] sm:$0xff] }
  0x68   : > { %v337_v41 = vadd.f32 %v1366_v16, %v313_v31  ;;  %v269_v43 = vadd.f32 %v1409_v40, %v245_v39  ;;  %v285_v44 = vld [vmem:[%s1325_s17 + $0xa8] sm:$0xff]  ;;  %v1418_v45 = vld [vmem:[%s1325_s17 + $0xb0] sm:$0xff]  ;;  %v262_v50 = vld [vmem:[%s1325_s17 + $0xc0] sm:$0xff] }
  0x69   : > { %352 = vst [vmem:[#allocation2] sm:$0xff] %v336_v30  ;;  %v338_v46 = vadd.f32 %v1385_v26, %v314_v35  ;;  %v315_v47 = vadd.f32 %v1389_v28, %v291_v36  ;;  %v292_v48 = vadd.f32 %v1400_v34, %v268_v37  ;;  %v246_v49 = vld [vmem:[#allocation2 + $0x30] sm:$0xff]  ;;  %v286_v51 = vld [vmem:[%s1325_s17 + $0xc8] sm:$0xff]  ;;  %v1426_v53 = vld [vmem:[%s1325_s17 + $0xb8] sm:$0xff] }
  0x6a   : > { %353 = vst [vmem:[#allocation2 + $0x8] sm:$0xff] %v337_v41  ;;  %v293_v52 = vadd.f32 %v285_v44, %v269_v43  ;;  %v270_v54 = vadd.f32 %v262_v50, %v246_v49  ;;  %v1429_v55 = vld [vmem:[%s1325_s17 + $0xd0] sm:$0xff]  ;;  %v247_v56 = vld [vmem:[#allocation2 + $0x38] sm:$0xff]  ;;  %v263_v60 = vld [vmem:[%s1325_s17 + $0xe0] sm:$0xff] }
  0x6b   : > { %354 = vst [vmem:[#allocation2 + $0x10] sm:$0xff] %v338_v46  ;;  %v339_v57 = vadd.f32 %v1394_v32, %v315_v47  ;;  %v316_v58 = vadd.f32 %v1406_v38, %v292_v48  ;;  %v1434_v59 = vld [vmem:[%s1325_s17 + $0xd8] sm:$0xff]  ;;  %v287_v61 = vld [vmem:[%s1325_s17 + $0xe8] sm:$0xff]  ;;  %v271_v0 = vadd.f32 %v263_v60, %v247_v56  ;;  %v311_v1 = vld [vmem:[%s1325_s17 + $0xf0] sm:$0xff] }
  0x6c   : > { %v317_v62 = vadd.f32 %v1418_v45, %v293_v52  ;;  %v294_v63 = vadd.f32 %v286_v51, %v270_v54  ;;  %v248_v2 = vld [vmem:[#allocation3] sm:$0xff]  ;;  %v249_v5 = vld [vmem:[#allocation3 + $0x8] sm:$0xff]  ;;  %v250_v14 = vld [vmem:[#allocation3 + $0x10] sm:$0xff] }
  0x6d   : > { %355 = vst [vmem:[#allocation2 + $0x18] sm:$0xff] %v339_v57  ;;  %v340_v7 = vadd.f32 %v1413_v42, %v316_v58  ;;  %v272_v11 = vmax.f32 %v248_v2, %v1339_v3  ;;  %v273_v12 = vmax.f32 %v249_v5, %v1352_v9  ;;  %v251_v17 = vld [vmem:[#allocation3 + $0x18] sm:$0xff]  ;;  %v252_v20 = vld [vmem:[#allocation3 + $0x20] sm:$0xff]  ;;  %v295_v25 = vadd.f32 %v287_v61, %v271_v0  ;;  %v253_v29 = vld [vmem:[#allocation3 + $0x28] sm:$0xff] }
  0x6e   : > { %v341_v21 = vadd.f32 %v1426_v53, %v317_v62  ;;  %v318_v22 = vadd.f32 %v1429_v55, %v294_v63  ;;  %v274_v27 = vmax.f32 %v250_v14, %v1363_v15  ;;  %v335_v30 = vld [vmem:[%s1325_s17 + $0xf8] sm:$0xff]  ;;  %v275_v3 = vmax.f32 %v251_v17, %v1378_v23  ;;  %v254_v36 = vld [vmem:[#allocation3 + $0x30] sm:$0xff] }
  0x6f   : > { %356 = vst [vmem:[#allocation2 + $0x20] sm:$0xff] %v340_v7  ;;  %v296_v31 = vmax.f32 %v272_v11, %v1342_v4  ;;  %v297_v35 = vmax.f32 %v273_v12, %v1355_v10  ;;  %v276_v9 = vmax.f32 %v252_v20, %v1397_v33  ;;  %v319_v39 = vadd.f32 %v311_v1, %v295_v25  ;;  %v255_v23 = vld [vmem:[#allocation3 + $0x38] sm:$0xff] }
  0x70   : > { %357 = vst [vmem:[#allocation2 + $0x28] sm:$0xff] %v341_v21  ;;  %v342_v37 = vadd.f32 %v1434_v59, %v318_v22  ;;  %v298_v41 = vmax.f32 %v274_v27, %v1370_v18  ;;  %v277_v15 = vmax.f32 %v253_v29, %v1409_v40  ;;  %v299_v4 = vmax.f32 %v275_v3, %v1381_v24 }
  0x71   : > { %v320_v43 = vmax.f32 %v296_v31, %v1346_v6  ;;  %v321_v46 = vmax.f32 %v297_v35, %v1360_v13  ;;  %v300_v10 = vmax.f32 %v276_v9, %v1400_v34  ;;  %v343_v33 = vadd.f32 %v335_v30, %v319_v39 }
  0x72   : > { %358 = vst [vmem:[#allocation2 + $0x30] sm:$0xff] %v342_v37  ;;  %v322_v47 = vmax.f32 %v298_v41, %v1373_v19  ;;  %v301_v48 = vmax.f32 %v277_v15, %v285_v44  ;;  %v278_v49 = vmax.f32 %v254_v36, %v262_v50  ;;  %v323_v40 = vmax.f32 %v299_v4, %v1389_v28 }
  0x73   : > { %v344_v52 = vmax.f32 %v320_v43, %v1349_v8  ;;  %v345_v18 = vmax.f32 %v321_v46, %v1366_v16  ;;  %v324_v6 = vmax.f32 %v300_v10, %v1406_v38  ;;  %359 = vst [vmem:[#allocation2 + $0x38] sm:$0xff] %v343_v33  ;;  %v279_v54 = vmax.f32 %v255_v23, %v263_v60 }
  0x74   : > { %v346_v13 = vmax.f32 %v322_v47, %v1385_v26  ;;  %v325_v24 = vmax.f32 %v301_v48, %v1418_v45  ;;  %v302_v34 = vmax.f32 %v278_v49, %v286_v51  ;;  %v347_v19 = vmax.f32 %v323_v40, %v1394_v32 }
  0x75   : > { %360 = vst [vmem:[#allocation3] sm:$0xff] %v344_v52  ;;  %361 = vst [vmem:[#allocation3 + $0x8] sm:$0xff] %v345_v18  ;;  %v348_v44 = vmax.f32 %v324_v6, %v1413_v42  ;;  %v303_v28 = vmax.f32 %v279_v54, %v287_v61 }
  0x76   : > { %362 = vst [vmem:[#allocation3 + $0x10] sm:$0xff] %v346_v13  ;;  %v349_v8 = vmax.f32 %v325_v24, %v1426_v53  ;;  %v326_v16 = vmax.f32 %v302_v34, %v1429_v55  ;;  %363 = vst [vmem:[#allocation3 + $0x18] sm:$0xff] %v347_v19 }
  0x77   : > { %364 = vst [vmem:[#allocation3 + $0x20] sm:$0xff] %v348_v44  ;;  %v327_v38 = vmax.f32 %v303_v28, %v311_v1 }
  0x78   : > { %365 = vst [vmem:[#allocation3 + $0x28] sm:$0xff] %v349_v8  ;;  %v350_v26 = vmax.f32 %v326_v16, %v1434_v59 }
  0x79   : > { %v351_v45 = vmax.f32 %v327_v38, %v335_v30 }
  0x7a   : > { %366 = vst [vmem:[#allocation3 + $0x30] sm:$0xff] %v350_v26 }
  0x7b   : > { %367 = vst [vmem:[#allocation3 + $0x38] sm:$0xff] %v351_v45 }
  0x7c PF: > { %p827_p0 = scmp.ne.s32.totalorder %s1126_s18, 1 }
  0x7d   : > { %v396_v32 = vlaneseq (!%p827_p0)  ;;  %v372_v42 = vld [vmem:[#allocation2] sm:$0xff] (!%p827_p0)  ;;  %v373_v57 = vld [vmem:[#allocation2 + $0x8] sm:$0xff] (!%p827_p0)  ;;  %v374_v58 = vld [vmem:[#allocation2 + $0x10] sm:$0xff] (!%p827_p0)  ;;  %v1149_v26 = vmov (!%p827_p0), 0.0|0.0   ;;  %vm1150_vm1 = vmmov (!%p827_p0), 0   ;;  %vm503_vm2 = vcmask (!%p827_p0), 7168  }
  0x7e   : > { %371 = sbr.rel (%p827_p0) target bundleno = 866 (0x362), region = 48  ;;  %v388_v50 = vld [vmem:[%s1325_s17] sm:$0xff] (!%p827_p0)  ;;  %v381_v59 = vld [vmem:[#allocation3 + $0x8] sm:$0xff] (!%p827_p0)  ;;  %v375_v60 = vld [vmem:[#allocation2 + $0x18] sm:$0xff] (!%p827_p0)  ;;  %872 = vmatprep.subr.bf16.mxu0 (!%p827_p0), %v1149_v26  ;;  %vm552_vm3 = vcmask (!%p827_p0), 523264   ;;  %vm632_vm4 = vcmask (!%p827_p0), 1043456  }
  0x7f   : > { %v1472_v51 = vand.u32 (!%p827_p0), 127, %v396_v32  ;;  %v380_v53 = vld [vmem:[#allocation3] sm:$0xff] (!%p827_p0)  ;;  %v382_v5 = vld [vmem:[#allocation3 + $0x10] sm:$0xff] (!%p827_p0)  ;;  %v383_v20 = vld [vmem:[#allocation3 + $0x18] sm:$0xff] (!%p827_p0)  ;;  %v1151_v32 = vmov (!%p827_p0), 0.0   ;;  %vm628_vm5 = vcmask (!%p827_p0), 31744  }
  0x80   : > { %v389_v55 = vld [vmem:[%s1325_s17 + $0x20] sm:$0xff] (!%p827_p0)  ;;  %v377_v21 = vld [vmem:[#allocation2 + $0x28] sm:$0xff] (!%p827_p0)  ;;  %v378_v39 = vld [vmem:[#allocation2 + $0x30] sm:$0xff] (!%p827_p0)  ;;  %864 = vmatprep.mubr.msk.f32.mxu0 (!%p827_p0), %vm1150_vm1, %v1151_v32  ;;  %867 = vmatprep.subr.mxu1 (!%p827_p0), %v1151_v32  ;;  %vm716_vm6 = vcmask (!%p827_p0), 516096  }
  0x81   : > { %v390_v56 = vld [vmem:[%s1325_s17 + $0x40] sm:$0xff] (!%p827_p0)  ;;  %vm398_vm0 = vcmp.lt.s32.totalorder (!%p827_p0), %v1472_v51, 64  ;;  %v385_v41 = vld [vmem:[#allocation3 + $0x28] sm:$0xff] (!%p827_p0)  ;;  %v379_v23 = vld [vmem:[#allocation2 + $0x38] sm:$0xff] (!%p827_p0)  ;;  %869 = vmatprep.mubr.msk.f32.mxu1 (!%p827_p0), %vm1150_vm1, %v1151_v32 }
  0x82   : > { %v391_v61 = vld [vmem:[%s1325_s17 + $0x60] sm:$0xff] (!%p827_p0)  ;;  %v399_v63 = vsel (!%p827_p0), %vm398_vm0, %v388_v50, 0.0  ;;  %v415_v0 = vsel (!%p827_p0), %vm398_vm0, %v388_v50, -inf  ;;  %v400_v1 = vsel (!%p827_p0), %vm398_vm0, %v389_v55, 0.0  ;;  %v401_v2 = vsel (!%p827_p0), %vm398_vm0, %v390_v56, 0.0  ;;  %v386_v33 = vld [vmem:[#allocation3 + $0x30] sm:$0xff] (!%p827_p0) }
  0x83   : > { %v392_v62 = vld [vmem:[%s1325_s17 + $0x80] sm:$0xff] (!%p827_p0)  ;;  %v407_v11 = vadd.f32 (!%p827_p0), %v399_v63, %v372_v42  ;;  %v423_v12 = vmax.f32 (!%p827_p0), %v380_v53, %v415_v0  ;;  %v408_v14 = vadd.f32 (!%p827_p0), %v400_v1, %v373_v57  ;;  %v409_v17 = vadd.f32 (!%p827_p0), %v401_v2, %v374_v58  ;;  %v387_v18 = vld [vmem:[#allocation3 + $0x38] sm:$0xff] (!%p827_p0)  ;;  %v513_v16 = vld [vmem:[%s1614_s1 + $0x8] sm:$0xff] (!%p827_p0) }
  0x84   : > { %v376_v7 = vld [vmem:[#allocation2 + $0x20] sm:$0xff] (!%p827_p0)  ;;  %v416_v25 = vsel (!%p827_p0), %vm398_vm0, %v389_v55, -inf  ;;  %v402_v27 = vsel (!%p827_p0), %vm398_vm0, %v391_v61, 0.0  ;;  %v417_v29 = vsel (!%p827_p0), %vm398_vm0, %v390_v56, -inf  ;;  %v403_v30 = vsel (!%p827_p0), %vm398_vm0, %v392_v62, 0.0  ;;  %v514_v28 = vld [vmem:[%s1614_s1 + $0x10] sm:$0xff] (!%p827_p0) }
  0x85   : > { %v393_v22 = vld [vmem:[%s1325_s17 + $0xa0] sm:$0xff]  ;;  %431 = vst [vmem:[#allocation2] sm:$0xff] %v407_v11  ;;  %455 = vadd.xlane.f32.xlu0 %v407_v11  ;;  %439 = vst [vmem:[#allocation3] sm:$0xff] %v423_v12  ;;  %487 = vmax.xlane.f32.xlu1 %v423_v12  ;;  %v424_v3 = vmax.f32 %v381_v59, %v416_v25  ;;  %v410_v9 = vadd.f32 %v402_v27, %v375_v60  ;;  %v418_v37 = vsel %vm398_vm0, %v391_v61, -inf  ;;  %v515_v45 = vld [vmem:[%s1614_s1 + $0x18] sm:$0xff] }
  0x86   : > { %v384_v31 = vld [vmem:[#allocation3 + $0x20] sm:$0xff]  ;;  %432 = vst [vmem:[#allocation2 + $0x8] sm:$0xff] %v408_v14  ;;  %433 = vst [vmem:[#allocation2 + $0x10] sm:$0xff] %v409_v17  ;;  %v425_v36 = vmax.f32 %v382_v5, %v417_v29  ;;  %v411_v43 = vadd.f32 %v403_v30, %v376_v7  ;;  %v426_v46 = vmax.f32 %v383_v20, %v418_v37  ;;  %v404_v4 = vsel %vm398_vm0, %v393_v22, 0.0  ;;  %v517_v51 = vld [vmem:[%s1614_s1 + $0x28] sm:$0xff] }
  0x87   : > { %v394_v35 = vld [vmem:[%s1325_s17 + $0xc0] sm:$0xff]  ;;  %v419_v10 = vsel %vm398_vm0, %v392_v62, -inf  ;;  %440 = vst [vmem:[#allocation3 + $0x8] sm:$0xff] %v424_v3  ;;  %434 = vst [vmem:[#allocation2 + $0x18] sm:$0xff] %v410_v9  ;;  %v412_v47 = vadd.f32 %v404_v4, %v377_v21  ;;  %v420_v52 = vsel %vm398_vm0, %v393_v22, -inf  ;;  %v876_v42 = vpack.c.bf16 %v515_v45, %v514_v28  ;;  %v518_v55 = vld [vmem:[%s1614_s1 + $0x30] sm:$0xff] }
  0x88   : > { %v395_v15 = vld [vmem:[%s1325_s17 + $0xe0] sm:$0xff]  ;;  %441 = vst [vmem:[#allocation3 + $0x10] sm:$0xff] %v425_v36  ;;  %v427_v48 = vmax.f32 %v384_v31, %v419_v10  ;;  %v405_v49 = vsel %vm398_vm0, %v394_v35, 0.0  ;;  %435 = vst [vmem:[#allocation2 + $0x20] sm:$0xff] %v411_v43  ;;  %v428_v6 = vmax.f32 %v385_v41, %v420_v52  ;;  %v421_v24 = vsel %vm398_vm0, %v394_v35, -inf  ;;  %v519_v56 = vld [vmem:[%s1614_s1 + $0x38] sm:$0xff] }
  0x89   : > { %442 = vst [vmem:[#allocation3 + $0x18] sm:$0xff] %v426_v46  ;;  %v413_v40 = vadd.f32 %v405_v49, %v378_v39  ;;  %v406_v13 = vsel %vm398_vm0, %v395_v15, 0.0  ;;  %457 = vadd.xlane.f32.xlu0 %v408_v14  ;;  %459 = vadd.xlane.f32.xlu1 %v409_v17  ;;  %436 = vst [vmem:[#allocation2 + $0x28] sm:$0xff] %v412_v47  ;;  %v429_v54 = vmax.f32 %v386_v33, %v421_v24  ;;  %v512_v8 = vld [vmem:[%s1614_s1] sm:$0xff] }
  0x8a   : > { %443 = vst [vmem:[#allocation3 + $0x20] sm:$0xff] %v427_v48  ;;  %v414_v34 = vadd.f32 %v406_v13, %v379_v23  ;;  %v422_v19 = vsel %vm398_vm0, %v395_v15, -inf  ;;  %444 = vst [vmem:[#allocation3 + $0x28] sm:$0xff] %v428_v6  ;;  %v873_v38 = vpack.c.bf16 %v513_v16, %v512_v8  ;;  %v516_v50 = vld [vmem:[%s1614_s1 + $0x20] sm:$0xff]  ;;  %v882_v57 = vpack.c.bf16 %v519_v56, %v518_v55 }
  0x8b   : > { %437 = vst [vmem:[#allocation2 + $0x30] sm:$0xff] %v413_v40  ;;  %v430_v44 = vmax.f32 %v387_v18, %v422_v19  ;;  %445 = vst [vmem:[#allocation3 + $0x30] sm:$0xff] %v429_v54  ;;  %v879_v53 = vpack.c.bf16 %v517_v51, %v516_v50  ;;  %v627_v4 = vld [vmem:[%s1615_s2] sm:$0xf] }
  0x8c   : > { %438 = vst [vmem:[#allocation2 + $0x38] sm:$0xff] %v414_v34  ;;  %874 = vmatpush3.bf16.msra.mxu0 %v873_v38  ;;  %868 = vmatpush3.msk.msra.mxu1 %vm632_vm4, %v627_v4 }
  0x8d   : > { %446 = vst [vmem:[#allocation3 + $0x38] sm:$0xff] %v430_v44  ;;  %489 = vmax.xlane.f32.xlu0 %v424_v3  ;;  %461 = vadd.xlane.f32.xlu1 %v410_v9 }
  0x8e   : > { %875 = vmatprep.subr.bf16.mxu0 %v1149_v26 }
  0x90   : > { %877 = vmatpush3.bf16.msra.mxu0 %v876_v42 }
  0x91   : > { %491 = vmax.xlane.f32.xlu0 %v425_v36  ;;  %463 = vadd.xlane.f32.xlu1 %v411_v43 }
  0x92   : > { %878 = vmatprep.subr.bf16.mxu0 %v1149_v26 }
  0x94   : > { %880 = vmatpush3.bf16.msra.mxu0 %v879_v53 }
  0x95   : > { %493 = vmax.xlane.f32.xlu0 %v426_v46  ;;  %465 = vadd.xlane.f32.xlu1 %v412_v47 }
  0x96   : > { %881 = vmatprep.subr.bf16.mxu0 %v1149_v26 }
  0x98   : > { %883 = vmatpush3.bf16.msra.mxu0 %v882_v57 }
  0x99   : > { %495 = vmax.xlane.f32.xlu0 %v427_v48  ;;  %467 = vadd.xlane.f32.xlu1 %v413_v40 }
  0x9d   : > { %497 = vmax.xlane.f32.xlu0 %v428_v6  ;;  %469 = vadd.xlane.f32.xlu1 %v414_v34 }
  0xa1   : > { %499 = vmax.xlane.f32.xlu0 %v429_v54  ;;  %501 = vmax.xlane.f32.xlu1 %v430_v44 }
 0x112   : > { %v456_v58 = vpop.xlane.xlu0 %455  ;;  %v488_v59 = vpop.xlane.xlu1 %487 }
 0x113   : > { %v471_v60 = vmul.f32 0.0017361111, %v456_v58 }
 0x115   : > { %v504_v61 = vsel %vm503_vm2, %v471_v60, %v488_v59 }
 0x116   : > { %520 = vxpose.xlu0.b32.start [1/8] (short) (narrow) %v504_v61, 8  ;;  %v458_v62 = vpop.xlane.xlu0 %457  ;;  %v460_v63 = vpop.xlane.xlu1 %459 }
 0x117   : > { %v472_v0 = vmul.f32 0.0017361111, %v458_v62  ;;  %v473_v7 = vmul.f32 0.0017361111, %v460_v63 }
 0x11a   : > { %v490_v1 = vpop.xlane.xlu0 %489  ;;  %v462_v2 = vpop.xlane.xlu1 %461 }
 0x11b   : > { %v505_v5 = vsel %vm503_vm2, %v472_v0, %v490_v1  ;;  %v474_v17 = vmul.f32 0.0017361111, %v462_v2 }
 0x11c   : > { %521 = vxpose.xlu0.b32.cont [2/8] (short) (narrow) %v505_v5, 8 }
 0x11e   : > { %v492_v11 = vpop.xlane.xlu0 %491  ;;  %v464_v12 = vpop.xlane.xlu1 %463 }
 0x11f   : > { %v506_v14 = vsel %vm503_vm2, %v473_v7, %v492_v11  ;;  %v475_v25 = vmul.f32 0.0017361111, %v464_v12 }
 0x120   : > { %522 = vxpose.xlu0.b32.cont [3/8] (short) (narrow) %v506_v14, 8 }
 0x122   : > { %v494_v20 = vpop.xlane.xlu0 %493  ;;  %v466_v21 = vpop.xlane.xlu1 %465 }
 0x123   : > { %v507_v22 = vsel %vm503_vm2, %v474_v17, %v494_v20  ;;  %v476_v31 = vmul.f32 0.0017361111, %v466_v21 }
 0x124   : > { %523 = vxpose.xlu0.b32.cont [4/8] (short) (narrow) %v507_v22, 8 }
 0x126   : > { %v496_v27 = vpop.xlane.xlu0 %495  ;;  %v468_v29 = vpop.xlane.xlu1 %467 }
 0x127   : > { %v508_v30 = vsel %vm503_vm2, %v475_v25, %v496_v27  ;;  %v477_v36 = vmul.f32 0.0017361111, %v468_v29 }
 0x128   : > { %524 = vxpose.xlu0.b32.cont [5/8] (short) (narrow) %v508_v30, 8 }
 0x12a   : > { %v498_v35 = vpop.xlane.xlu0 %497  ;;  %v470_v3 = vpop.xlane.xlu1 %469 }
 0x12b   : > { %v509_v9 = vsel %vm503_vm2, %v476_v31, %v498_v35  ;;  %v478_v39 = vmul.f32 0.0017361111, %v470_v3 }
 0x12c   : > { %525 = vxpose.xlu0.b32.cont [6/8] (short) (narrow) %v509_v9, 8 }
 0x12e   : > { %v500_v37 = vpop.xlane.xlu0 %499  ;;  %v502_v15 = vpop.xlane.xlu1 %501 }
 0x12f   : > { %v510_v41 = vsel %vm503_vm2, %v477_v36, %v500_v37  ;;  %v511_v43 = vsel %vm503_vm2, %v478_v39, %v502_v15 }
 0x130   : > { %526 = vxpose.xlu0.b32.cont [7/8] (short) (narrow) %v510_v41, 8 }
 0x134   : > { %527 = vxpose.xlu0.b32.end [8/8] (short) (narrow) %v511_v43, 8 }
 0x198   : > { %v536_v46 = vpop.trf.xlu0 }
 0x199   : > { %865 = vmatmul.mubr.msk.f32.vlgmr.msra.gmra.mrb[0].mxu0 %vm552_vm3, %v536_v46 }
 0x26c   : > { %v622_v10 = vpop.f32.mrb[0].mxu0 }
 0x26d   : > { %v626_v23 = vmax.f32 %v622_v10, 0.0  ;;  %v866_v33 = vpop.f32.mrb[1].mxu0 }
 0x26f   : > { %870 = vmatmul.mubr.msk.f32.vlgmr.msra.gmra.mrb[0].mxu1 %vm628_vm5, %v626_v23 }
 0x342   : > { %v702_v47 = vpop.f32.mrb[0].mxu1 }
 0x343   : > { %v707_v48 = vrot.slane %v702_v47, 1  ;;  %v871_v49 = vpop.f32.mrb[1].mxu1 }
 0x345   : > { %v709_v52 = vadd.f32 %v707_v48, %v702_v47 }
 0x347   : > { %v831_v18 = vmul.f32 -1.442695, %v709_v52 }
 0x349   : > { %988 = vpow2.f32 %v831_v18 }
 0x353   : > { %v989_v40 = vpop.eup %988 }
 0x354   : > { %v713_v6 = vadd.f32 1.0, %v989_v40 }
 0x356   : > { %990 = vrcp.f32 %v713_v6 }
 0x360   : > { %v991_v13 = vpop.eup %990 }
 0x361   : > { %717 = vst.msk [vmem:[%s1334_s28] sm:$0x1] %vm716_vm6, %v991_v13 }
 0x362 PF: > { %s832_s30 = sshll.u32 %s1130_s19, 4  ;;  %s731_s9 = sshll.u32 %s1334_s28, 4  ;;  %s732_s9 = int_to_ptr.vmem [resolvable:$true] %s731_s9 }
 0x363   : > { %s1554_s20 = scalar_lea.hbm %s1616_s3, %s832_s30  ;;  %s719_s27 = scalar_lea.sflag [#allocation6], %s209_s26 }
 0x364   : > { %s1020_s23 = scalar_lea.vmem %s732_s9, 16  ;;  %s1152_s5 = smov [#allocation7]  }
 0x365   : > { %p1021_p2 = scmp.ne.s32.totalorder %s732_s9, %s1020_s23  ;;  %s1024_s15 = sshll.u32 %s1152_s5, 4  ;;  %s1025_s15 = int_to_ptr.vmem [resolvable:$false] %s1024_s15 }
 0x366   : > { %s1026_s29 = scalar_lea.vmem %s1025_s15, 32  ;;  %p1027_p6 = scmp.lt.s32.totalorder %s732_s9, %s1025_s15 }
 0x367   : > { %p1022_p4 = pnand %p1021_p2, %p1255_p12  ;;  %p1028_p9 = scmp.lt.s32.totalorder %s1026_s29, %s1020_s23 }
 0x369   : > { %p1023_p5 = pneg %p1022_p4  ;;  %p1029_p10 = por %p1028_p9, %p1027_p6 }
 0x36b   : > { %p1030_p11 = pnand %p1029_p10, %p1023_p5 }
 0x36d   : > { %1033 = shalt.err (!%p1030_p11)
}
 0x36e   : > { %s1034_s19 = scalar_lea.hbm %s1554_s20, 16  ;;  %s1038_s25 = scalar_lea.hbm %s1616_s3, 32 }
 0x36f   : > { %p1035_p8 = scmp.ne.s32.totalorder %s1554_s20, %s1034_s19  ;;  %p1039_p3 = scmp.lt.u32.totalorder %s1554_s20, %s1616_s3 }
 0x370   : > { %p1040_p7 = scmp.lt.u32.totalorder %s1038_s25, %s1034_s19  ;;  %p1042_p2 = scmp.lt.u32.totalorder %s1034_s19, %s1554_s20 }
 0x371   : > { %p1036_p13 = pnand %p1035_p8, %p1255_p12 }
 0x372   : > { %p1041_p0 = por %p1040_p7, %p1039_p3 }
 0x373   : > { %p1037_p1 = pneg %p1036_p13 }
 0x374   : > { %p1043_p4 = por %p1042_p2, %p1041_p0 }
 0x376   : > { %p1044_p5 = pnand %p1043_p4, %p1037_p1 }
 0x378   : > { %1047 = shalt.err (!%p1044_p5)
}
 0x379   : > { %886 = dma.vmem_to_hbm [thread:$0]  (%p1255_p12), %s732_s9, 16, %s1554_s20, %s719_s27  }
 0x37a PF: > { %p892_p6 = scmp.ge.s32.totalorder %s1142_s22, 2  ;;  %s743_s4 = sand.u32 1, %s1102_s12  }
 0x37b   : > { %p1630_p9 = scmp.ne.s32.totalorder %s1629_s10, 0  ;;  %s744_s24 = scalar_lea.sflag [#allocation6], %s743_s4 }
 0x37d   : > { %p889_p10 = pnand %p892_p6, %p1630_p9 }
 0x37f   : > { %1097 = dma.done.wait (!%p889_p10), %s744_s24, 16  }
 0x380   : > { %1099 = vsyncadd (!%p889_p10), %s744_s24, 4294967280  ;;  %s19_s22 = sadd.s32 1, %s1142_s22   ;;  %s1631_s7 = sld [smem:[#allocation10_spill]] }
 0x381   : > { %p16_p11 = scmp.ge.s32.totalorder %s19_s22, 6   ;;  %s1632_s17 = sld [smem:[#allocation14_spill]] }
 0x382   : > { %s1633_s18 = sld [smem:[#allocation11_spill]]  ;;  %s1634_s20 = sld [smem:[#allocation12_spill]] }
 0x383   : > { %s1635_s30 = sld [smem:[#allocation13_spill]]  ;;  %s1636_s12 = smov %s1106_s13 }
 0x384   : > { %s1637_s13 = smov %s1110_s14  ;;  %s1638_s14 = smov %s1260_s8 }
 0x385   : > { %s1639_s15 = smov %s1118_s16  ;;  %s1641_s19 = smov %s1138_s21 }
 0x386   : > { %s1640_s16 = smov %s1631_s7  ;;  %18 = sbr.rel (!%p16_p11) target bundleno = 9 (0x9), region = 89 }
 0x389   : > { %s1642_s21 = smov %s1635_s30 }
 0x38d   :  { %748 = vsyncpa [#allocation5], 1 }
 0x38e   :  { %750 = vsyncpa [#allocation5 + $0x1], 1 }
 0x38f   :  { %751 = vsyncpa [#allocation6], 1 }
 0x390   :  { %753 = vsyncpa [#allocation6 + $0x1], 1 }

</bundles_post_ra>
